<compile_context>
chip_gen: v6e
topology: v6e:2x2x1
jax: 0.10.0
libtpu: 0.0.40
codegen_flags: <defaults>
</compile_context>

<pallas_src>
import functools

import jax
import jax.numpy as jnp
from jax.experimental import pallas as pl
from jax.experimental.pallas import tpu as pltpu

LANE = 128     # TPU lane width -> one lane-dense output vreg row per batch row
SUBLANE = 8    # pad batch to a full sublane group for an unmasked dense store


def actor_critic_kernel(x_ref, w1_ref, w2_ref, b2_ref, out_ref, *, num_actions):
    """Fused two-head MLP forward.

    x_ref  : [Bp, I+1]  state with trailing ones column (folds layer-1 biases)
    w1_ref : [I+1, 2H]  [w1c | w1a]; last row = [b1c | b1a]
    w2_ref : [2H, 128]  rows H..2H-1, cols 0..A-1 = w2a ; rows 0..H-1, col A = w2c
    b2_ref : [1, 128]   lanes 0..A-1 = b2a ; lane A = b2c ; rest 0
    out_ref: [Bp, 128]  lanes 0..A-1 = softmax policy ; lane A = value
    """
    x = x_ref[...]

    # Layer 1 (both heads, bias folded) + ReLU: one MXU push.
    h = jnp.maximum(
        jnp.dot(x, w1_ref[...], preferred_element_type=jnp.float32), 0.0)

    # Layer 2 (both heads) -> lane-dense [Bp, 128] slab: one MXU push.
    z = jnp.dot(h, w2_ref[...], preferred_element_type=jnp.float32) + b2_ref[...]

    # Numerically-stable softmax restricted to the action lanes: non-action
    # lanes are masked to -inf so exp() contributes exactly 0 to the sum.
    lane = jax.lax.broadcasted_iota(jnp.int32, z.shape, 1)
    masked = jnp.where(lane < num_actions, z, -jnp.inf)
    m = jnp.max(masked, axis=1, keepdims=True)
    e = jnp.exp(masked - m)
    denom = jnp.sum(e, axis=1, keepdims=True)
    policy = e * pl.reciprocal(denom, approx=True)   # EUP vrcp, off the VPU path

    # Single unmasked, 128-wide store: policy in lanes 0..A-1, value in lane A.
    out_ref[...] = jnp.where(lane == num_actions, z, policy)


def pack_params(p, num_inputs, num_actions, hidden_size):
    """Pack the four Linear layers into fused, MXU/DMA-friendly operands."""
    I, H, A = num_inputs, hidden_size, num_actions
    assert A + 1 <= LANE, "num_actions + value lane must fit in one 128-lane slab"

    # Layer 1: [I+1, 2H]; bias row folded in (state gets a ones column).
    w1 = jnp.zeros((I + 1, 2 * H), jnp.float32)
    w1 = w1.at[:I, :H].set(p["w1c"]).at[:I, H:].set(p["w1a"])
    w1 = w1.at[I, :H].set(p["b1c"]).at[I, H:].set(p["b1a"])

    # Layer 2: block layout into a single 128-lane output slab.
    w2 = jnp.zeros((2 * H, LANE), jnp.float32)
    w2 = w2.at[H:, :A].set(p["w2a"])           # actor:  h_a @ w2a -> lanes 0..A-1
    w2 = w2.at[:H, A].set(p["w2c"][:, 0])      # critic: h_c @ w2c -> lane A

    b2 = jnp.zeros((1, LANE), jnp.float32)
    b2 = b2.at[0, :A].set(p["b2a"]).at[0, A].set(p["b2c"][0])
    return dict(w1=w1, w2=w2, b2=b2)


@functools.partial(jax.jit, static_argnames=("num_actions",))
def actor_critic_forward(state, packed, *, num_actions):
    """state: [B, num_inputs] f32.  packed: dict from pack_params()."""
    B, I = state.shape
    Bp = SUBLANE * pl.cdiv(B, SUBLANE)

    # Augment with a ones column (layer-1 bias fold) and pad the batch to a
    # full sublane group.  Batching more environments/timesteps into B (up to
    # whatever fits the sublane padding) amortizes the weight DMA for free.
    x = jnp.zeros((Bp, I + 1), jnp.float32)
    x = x.at[:B, :I].set(state)
    x = x.at[:, I].set(1.0)

    vmem = lambda: pl.BlockSpec(memory_space=pltpu.MemorySpace.VMEM)
    out = pl.pallas_call(
        functools.partial(actor_critic_kernel, num_actions=num_actions),
        out_shape=jax.ShapeDtypeStruct((Bp, LANE), jnp.float32),
        in_specs=[vmem() for _ in range(4)],
        out_specs=vmem(),
    )(x, packed["w1"], packed["w2"], packed["b2"])

    value = out[:B, num_actions:num_actions + 1]   # [B, 1]
    policy = out[:B, :num_actions]                 # [B, A]
    return value, policy


def init_params(key, num_inputs, num_actions, hidden_size):
    """nn.Linear-style U(-1/sqrt(fan_in), 1/sqrt(fan_in)) init, input-major."""
    ks = jax.random.split(key, 8)

    def lin(kw, kb, fan_in, fan_out):
        bound = 1.0 / jnp.sqrt(float(fan_in))
        w = jax.random.uniform(kw, (fan_in, fan_out), jnp.float32, -bound, bound)
        b = jax.random.uniform(kb, (fan_out,), jnp.float32, -bound, bound)
        return w, b

    w1c, b1c = lin(ks[0], ks[1], num_inputs, hidden_size)
    w2c, b2c = lin(ks[2], ks[3], hidden_size, 1)
    w1a, b1a = lin(ks[4], ks[5], num_inputs, hidden_size)
    w2a, b2a = lin(ks[6], ks[7], hidden_size, num_actions)
    return dict(w1c=w1c, b1c=b1c, w2c=w2c, b2c=b2c,
                w1a=w1a, b1a=b1a, w2a=w2a, b2a=b2a)


def reference_forward(state, p):
    """Pure-JAX reference matching the PyTorch module semantics."""
    h_c = jax.nn.relu(state @ p["w1c"] + p["b1c"])
    value = h_c @ p["w2c"] + p["b2c"]
    h_a = jax.nn.relu(state @ p["w1a"] + p["b1a"])
    policy = jax.nn.softmax(h_a @ p["w2a"] + p["b2a"], axis=1)
    return value, policy


if __name__ == "__main__":
    num_inputs = 16
    num_actions = 8
    hidden_size = 256   # module default

    key = jax.random.PRNGKey(0)
    k_param, k_state = jax.random.split(key)
    params = init_params(k_param, num_inputs, num_actions, hidden_size)
    packed = pack_params(params, num_inputs, num_actions, hidden_size)

    # Equivalent of `torch.from_numpy(state).float().unsqueeze(0)` -> B=1.
    state = jax.random.normal(k_state, (1, num_inputs), dtype=jnp.float32)

    value, policy = actor_critic_forward(state, packed, num_actions=num_actions)
    value, policy = jax.block_until_ready((value, policy))

    ref_value, ref_policy = reference_forward(state, params)
    assert value.shape == (1, 1) and policy.shape == (1, num_actions)
    # Tolerances account for the approx-reciprocal softmax normalization.
    assert jnp.allclose(value, ref_value, atol=2e-3, rtol=2e-3)
    assert jnp.allclose(policy, ref_policy, atol=2e-3, rtol=2e-3)
    assert jnp.allclose(jnp.sum(policy, axis=1), 1.0, atol=2e-3)

    print("KERNEL_OK")
</pallas_src>

<mosaic_0001>
module attributes {stable_mosaic.version = 11 : i64} {
  func.func @actor_critic_kernel(%arg0: memref<8x17xf32, #tpu.memory_space<vmem>>, %arg1: memref<17x512xf32, #tpu.memory_space<vmem>>, %arg2: memref<512x128xf32, #tpu.memory_space<vmem>>, %arg3: memref<1x128xf32, #tpu.memory_space<vmem>>, %arg4: memref<8x128xf32, #tpu.memory_space<vmem>>) attributes {dimension_semantics = [], scalar_prefetch = 0 : i64, scratch_operands = 0 : i64, tpu.core_type = #tpu.core_type<tc>} {
    %c0 = arith.constant 0 : index
    %c0_0 = arith.constant 0 : index
    %0 = vector.load %arg0[%c0, %c0_0] : memref<8x17xf32, #tpu.memory_space<vmem>>, vector<8x17xf32>
    %c0_1 = arith.constant 0 : index
    %c0_2 = arith.constant 0 : index
    %1 = vector.load %arg1[%c0_1, %c0_2] : memref<17x512xf32, #tpu.memory_space<vmem>>, vector<17x512xf32>
    %cst = arith.constant dense<0.000000e+00> : vector<8x512xf32>
    %2 = tpu.matmul %0, %1, %cst {dimension_numbers = #tpu.dot_dimension_numbers<[1], [0], [0], [1], [0, 0, 1, 1], [], []>} : vector<8x17xf32>, vector<17x512xf32>, vector<8x512xf32> -> vector<8x512xf32>
    %cst_3 = arith.constant 0.000000e+00 : f32
    %3 = vector.broadcast %cst_3 : f32 to vector<8x512xf32>
    %4 = arith.maximumf %2, %3 : vector<8x512xf32>
    %c0_4 = arith.constant 0 : index
    %c0_5 = arith.constant 0 : index
    %5 = vector.load %arg2[%c0_4, %c0_5] : memref<512x128xf32, #tpu.memory_space<vmem>>, vector<512x128xf32>
    %cst_6 = arith.constant dense<0.000000e+00> : vector<8x128xf32>
    %6 = tpu.matmul %4, %5, %cst_6 {dimension_numbers = #tpu.dot_dimension_numbers<[1], [0], [0], [1], [0, 0, 1, 1], [], []>} : vector<8x512xf32>, vector<512x128xf32>, vector<8x128xf32> -> vector<8x128xf32>
    %c0_7 = arith.constant 0 : index
    %c0_8 = arith.constant 0 : index
    %7 = vector.load %arg3[%c0_7, %c0_8] : memref<1x128xf32, #tpu.memory_space<vmem>>, vector<1x128xf32>
    %8 = vector.broadcast %7 : vector<1x128xf32> to vector<8x128xf32>
    %9 = arith.addf %6, %8 : vector<8x128xf32>
    %10 = tpu.iota {dimensions = array<i32: 1>} : vector<8x128xi32>
    %c8_i32 = arith.constant 8 : i32
    %11 = vector.broadcast %c8_i32 : i32 to vector<8x128xi32>
    %12 = arith.cmpi slt, %10, %11 : vector<8x128xi32>
    %cst_9 = arith.constant 0xFF800000 : f32
    %13 = vector.broadcast %cst_9 : f32 to vector<8x128xf32>
    %14 = arith.select %12, %9, %13 : vector<8x128xi1>, vector<8x128xf32>
    %cst_10 = arith.constant dense<0xFF800000> : vector<8xf32>
    %15 = vector.multi_reduction <maximumf>, %14, %cst_10 [1] : vector<8x128xf32> to vector<8xf32>
    %16 = vector.shape_cast %15 : vector<8xf32> to vector<8x1xf32>
    %17 = vector.broadcast %16 : vector<8x1xf32> to vector<8x128xf32>
    %18 = arith.subf %14, %17 : vector<8x128xf32>
    %19 = math.exp %18 : vector<8x128xf32>
    %cst_11 = arith.constant dense<0.000000e+00> : vector<8xf32>
    %20 = vector.multi_reduction <add>, %19, %cst_11 [1] : vector<8x128xf32> to vector<8xf32>
    %21 = vector.shape_cast %20 : vector<8xf32> to vector<8x1xf32>
    %22 = tpu.reciprocal %21 {approx = true} : vector<8x1xf32> -> vector<8x1xf32>
    %23 = vector.broadcast %22 : vector<8x1xf32> to vector<8x128xf32>
    %24 = arith.mulf %19, %23 : vector<8x128xf32>
    %c8_i32_12 = arith.constant 8 : i32
    %25 = vector.broadcast %c8_i32_12 : i32 to vector<8x128xi32>
    %26 = arith.cmpi eq, %10, %25 : vector<8x128xi32>
    %27 = arith.select %26, %9, %24 : vector<8x128xi1>, vector<8x128xf32>
    %c0_13 = arith.constant 0 : index
    %c0_14 = arith.constant 0 : index
    %28 = vector.load %arg4[%c0_13, %c0_14] : memref<8x128xf32, #tpu.memory_space<vmem>>, vector<8x128xf32>
    tpu.vector_store %arg4[%c0_13, %c0_14], %27 {strides = array<i32>} : memref<8x128xf32, #tpu.memory_space<vmem>>, vector<8x128xf32>,
    return
  }
}

</mosaic_0001>

<bundles_post_ra>
// kernel: actor_critic_forward.1
= control target key start
LH: loop header
LB: loop body
LE: loop exit
PB: predicated region body
PF: predicated region fallthrough
CT: control target
= control target key end

     0   :  { %9 = vsyncpa [#allocation3], 0  ;;  %s633_s0 = inlined_call_operand.vmem [shape: f32[8,17], index: 0, kind: input, shape index: {}]   ;;  %s634_s1 = inlined_call_operand.hbm [shape: f32[17,512], index: 1, kind: input, shape index: {}]   ;;  %s635_s2 = inlined_call_operand.hbm [shape: f32[512,128], index: 2, kind: input, shape index: {}]   ;;  %s636_s3 = inlined_call_operand.vmem [shape: f32[1,128], index: 3, kind: input, shape index: {}]   ;;  %s637_s4 = inlined_call_operand.vmem [shape: f32[8,128], index: 4, kind: output, shape index: {}]  }
   0x1   :  { %10 = vsyncpa [#allocation5], 0  ;;  %s586_s15 = smov [#allocation2]  }
   0x2   :  { %s18_s16 = sshll.u32 %s586_s15, 4  ;;  %s19_s16 = int_to_ptr.vmem [resolvable:$true] %s18_s16 }
   0x3   :  { %s550_s17 = scalar_lea.vmem %s19_s16, 1536  ;;  %p555_p1 = scmp.lt.s32.totalorder %s19_s16, %s19_s16 }
   0x4   :  { %p551_p0 = scmp.ne.s32.totalorder %s19_s16, %s550_s17  ;;  %p556_p2 = scmp.lt.s32.totalorder %s550_s17, %s550_s17 }
   0x6   :  { %p557_p3 = por %p556_p2, %p555_p1 }
   0x8   :  { %p558_p4 = pnand %p557_p3, %p551_p0 }
   0xa   :  { %561 = shalt.err (!%p558_p4)
}
   0xb   :  { %s587_s18 = smov 512   ;;  %s588_s19 = smov 32  }
   0xc   :  { %24 = dma.hbm_to_vmem [thread:$0]  %s634_s1, 1536, %s19_s16, [#allocation3], %s587_s18, %s587_s18, %s588_s19  }
   0xd   :  { %s589_s22 = smov [#allocation4]  }
   0xe   :  { %s30_s23 = sshll.u32 %s589_s22, 4  ;;  %s31_s23 = int_to_ptr.vmem [resolvable:$true] %s30_s23 }
   0xf   :  { %s570_s24 = scalar_lea.vmem %s31_s23, 8192  ;;  %p575_p6 = scmp.lt.s32.totalorder %s31_s23, %s31_s23 }
  0x10   :  { %p571_p5 = scmp.ne.s32.totalorder %s31_s23, %s570_s24  ;;  %p576_p7 = scmp.lt.s32.totalorder %s570_s24, %s570_s24 }
  0x12   :  { %p577_p8 = por %p576_p7, %p575_p6 }
  0x14   :  { %p578_p9 = pnand %p577_p8, %p571_p5 }
  0x16   :  { %581 = shalt.err (!%p578_p9)
}
  0x17   :  { %s590_s25 = smov 128   ;;  %s591_s26 = smov 8  }
  0x18   :  { %36 = dma.hbm_to_vmem [thread:$0]  %s635_s2, 8192, %s31_s23, [#allocation5], %s590_s25, %s590_s25, %s591_s26  }
  0x19   :  { %582 = dma.done.wait [#allocation3], 1536  }
  0x1a   :  { %583 = vsyncadd [#allocation3], 4294965760 }
  0x1b   :  { %584 = dma.done.wait [#allocation5], 8192  }
  0x1c   :  { %585 = vsyncadd [#allocation5], 4294959104  ;;  %v592_v0 = vmov 0.0   ;;  %vm62_vm0 = vcmask 1040384   ;;  %v55_v1 = vld [vmem:[#allocation2 + $0x48] sm:$0x1] }
  0x1d   :  { %139 = vmatprep.mubr.f32.mxu0 %v592_v0  ;;  %210 = vmatprep.mubr.f32.mxu1 %v592_v0  ;;  %v57_v2 = vld [vmem:[#allocation2 + $0x58] sm:$0x1]  ;;  %v54_v3 = vld [vmem:[#allocation2 + $0x40] sm:$0x1]  ;;  %v56_v4 = vld [vmem:[#allocation2 + $0x50] sm:$0x1] }
  0x1e   :  { %454 = vmatprep.subr.msk.mxu0 %vm62_vm0, %v55_v1  ;;  %457 = vmatprep.subr.msk.mxu1 %vm62_vm0, %v57_v2  ;;  %v51_v5 = vld [vmem:[#allocation2 + $0x28] sm:$0xff]  ;;  %v53_v6 = vld [vmem:[#allocation2 + $0x38] sm:$0xff]  ;;  %v50_v7 = vld [vmem:[#allocation2 + $0x20] sm:$0xff]  ;;  %vm58_vm1 = vcmask 138240  }
  0x1f   :  { %455 = vmatpush1.msk.msra.mxu0 %vm62_vm0, %v54_v3  ;;  %458 = vmatpush1.msk.msra.mxu1 %vm62_vm0, %v56_v4  ;;  %v52_v8 = vld [vmem:[#allocation2 + $0x30] sm:$0xff]  ;;  %v47_v9 = vld [vmem:[#allocation2 + $0x8] sm:$0xff]  ;;  %v49_v10 = vld [vmem:[#allocation2 + $0x18] sm:$0xff] }
  0x20   :  { %103 = vmatprep.subr.mxu0 %v51_v5  ;;  %174 = vmatprep.subr.mxu1 %v53_v6  ;;  %v46_v11 = vld [vmem:[#allocation2] sm:$0xff]  ;;  %v48_v12 = vld [vmem:[#allocation2 + $0x10] sm:$0xff]  ;;  %v252_v14 = vld [vmem:[#allocation4 + $0xf8] sm:$0xff] }
  0x21   :  { %104 = vmatpush1.msra.mxu0 %v50_v7  ;;  %175 = vmatpush1.msra.mxu1 %v52_v8  ;;  %v45_v13 = vld [vmem:[%s633_s0] sm:$0xff]  ;;  %v284_v15 = vld [vmem:[#allocation4 + $0x1f8] sm:$0xff]  ;;  %v251_v18 = vld [vmem:[#allocation4 + $0xf0] sm:$0xff] }
  0x22   :  { %105 = vmatprep.subr.mxu0 %v47_v9  ;;  %176 = vmatprep.subr.mxu1 %v49_v10  ;;  %v236_v16 = vld [vmem:[#allocation4 + $0x78] sm:$0xff]  ;;  %v283_v19 = vld [vmem:[#allocation4 + $0x1f0] sm:$0xff]  ;;  %v250_v22 = vld [vmem:[#allocation4 + $0xe8] sm:$0xff] }
  0x23   :  { %106 = vmatpush1.msra.mxu0 %v46_v11  ;;  %177 = vmatpush1.msra.mxu1 %v48_v12  ;;  %v268_v17 = vld [vmem:[#allocation4 + $0x178] sm:$0xff]  ;;  %v235_v20 = vld [vmem:[#allocation4 + $0x70] sm:$0xff]  ;;  %v282_v23 = vld [vmem:[#allocation4 + $0x1e8] sm:$0xff] }
  0x24   :  { %456 = vmatmul.mubr.msk.f32.vlgmr.msra.gmra.mxu0 %vm58_vm1, %v45_v13  ;;  %459 = vmatmul.mubr.msk.f32.vlgmr.msra.gmra.mxu1 %vm58_vm1, %v45_v13  ;;  %v267_v21 = vld [vmem:[#allocation4 + $0x170] sm:$0xff]  ;;  %v234_v24 = vld [vmem:[#allocation4 + $0x68] sm:$0xff]  ;;  %v249_v26 = vld [vmem:[#allocation4 + $0xe0] sm:$0xff] }
  0x25   :  { %461 = vmatprep.subr.mxu0 %v252_v14  ;;  %496 = vmatprep.subr.mxu1 %v284_v15  ;;  %v266_v25 = vld [vmem:[#allocation4 + $0x168] sm:$0xff]  ;;  %v281_v27 = vld [vmem:[#allocation4 + $0x1e0] sm:$0xff]  ;;  %v248_v30 = vld [vmem:[#allocation4 + $0xd8] sm:$0xff] }
  0x26   :  { %462 = vmatpush3.msra.mxu0 %v236_v16  ;;  %497 = vmatpush3.msra.mxu1 %v268_v17  ;;  %v233_v28 = vld [vmem:[#allocation4 + $0x60] sm:$0xff]  ;;  %v280_v31 = vld [vmem:[#allocation4 + $0x1d8] sm:$0xff]  ;;  %v247_v34 = vld [vmem:[#allocation4 + $0xd0] sm:$0xff] }
  0x27   :  { %463 = vmatprep.subr.mxu0 %v251_v18  ;;  %498 = vmatprep.subr.mxu1 %v283_v19  ;;  %v265_v29 = vld [vmem:[#allocation4 + $0x160] sm:$0xff]  ;;  %v232_v32 = vld [vmem:[#allocation4 + $0x58] sm:$0xff]  ;;  %v279_v35 = vld [vmem:[#allocation4 + $0x1d0] sm:$0xff] }
  0x28   :  { %464 = vmatpush3.msra.mxu0 %v235_v20  ;;  %499 = vmatpush3.msra.mxu1 %v267_v21  ;;  %v264_v33 = vld [vmem:[#allocation4 + $0x158] sm:$0xff]  ;;  %v231_v36 = vld [vmem:[#allocation4 + $0x50] sm:$0xff]  ;;  %v246_v38 = vld [vmem:[#allocation4 + $0xc8] sm:$0xff] }
  0x29   :  { %465 = vmatprep.subr.mxu0 %v250_v22  ;;  %500 = vmatprep.subr.mxu1 %v282_v23  ;;  %v263_v37 = vld [vmem:[#allocation4 + $0x150] sm:$0xff]  ;;  %v278_v39 = vld [vmem:[#allocation4 + $0x1c8] sm:$0xff]  ;;  %v245_v42 = vld [vmem:[#allocation4 + $0xc0] sm:$0xff]  ;;  %v432_v22 = vlaneseq }
  0x2a   :  { %466 = vmatpush3.msra.mxu0 %v234_v24  ;;  %501 = vmatpush3.msra.mxu1 %v266_v25  ;;  %v230_v40 = vld [vmem:[#allocation4 + $0x48] sm:$0xff]  ;;  %v277_v43 = vld [vmem:[#allocation4 + $0x1c0] sm:$0xff]  ;;  %v244_v46 = vld [vmem:[#allocation4 + $0xb8] sm:$0xff] }
  0x2b   :  { %467 = vmatprep.subr.mxu0 %v249_v26  ;;  %502 = vmatprep.subr.mxu1 %v281_v27  ;;  %v262_v41 = vld [vmem:[#allocation4 + $0x148] sm:$0xff]  ;;  %v229_v44 = vld [vmem:[#allocation4 + $0x40] sm:$0xff]  ;;  %v276_v47 = vld [vmem:[#allocation4 + $0x1b8] sm:$0xff] }
  0x2c   :  { %468 = vmatpush3.msra.mxu0 %v233_v28  ;;  %503 = vmatpush3.msra.mxu1 %v265_v29  ;;  %v261_v45 = vld [vmem:[#allocation4 + $0x140] sm:$0xff]  ;;  %v228_v48 = vld [vmem:[#allocation4 + $0x38] sm:$0xff]  ;;  %v243_v50 = vld [vmem:[#allocation4 + $0xb0] sm:$0xff]  ;;  %v433_v28 = vand.u32 127, %v432_v22 }
  0x2d   :  { %469 = vmatprep.subr.mxu0 %v248_v30  ;;  %504 = vmatprep.subr.mxu1 %v280_v31  ;;  %v260_v49 = vld [vmem:[#allocation4 + $0x138] sm:$0xff]  ;;  %v275_v51 = vld [vmem:[#allocation4 + $0x1b0] sm:$0xff]  ;;  %v242_v54 = vld [vmem:[#allocation4 + $0xa8] sm:$0xff] }
  0x2e   :  { %470 = vmatpush3.msra.mxu0 %v232_v32  ;;  %505 = vmatpush3.msra.mxu1 %v264_v33  ;;  %v227_v52 = vld [vmem:[#allocation4 + $0x30] sm:$0xff]  ;;  %v274_v55 = vld [vmem:[#allocation4 + $0x1a8] sm:$0xff]  ;;  %v241_v58 = vld [vmem:[#allocation4 + $0xa0] sm:$0xff]  ;;  %vm434_vm2 = vcmp.lt.s32.totalorder %v433_v28, 8  ;;  %vm445_vm3 = vcmp.eq.s32.totalorder %v433_v28, 8 }
  0x2f   :  { %471 = vmatprep.subr.mxu0 %v247_v34  ;;  %506 = vmatprep.subr.mxu1 %v279_v35  ;;  %v259_v53 = vld [vmem:[#allocation4 + $0x130] sm:$0xff]  ;;  %v226_v56 = vld [vmem:[#allocation4 + $0x28] sm:$0xff]  ;;  %v273_v59 = vld [vmem:[#allocation4 + $0x1a0] sm:$0xff] }
  0x30   :  { %472 = vmatpush3.msra.mxu0 %v231_v36  ;;  %507 = vmatpush3.msra.mxu1 %v263_v37  ;;  %v258_v57 = vld [vmem:[#allocation4 + $0x128] sm:$0xff]  ;;  %v225_v60 = vld [vmem:[#allocation4 + $0x20] sm:$0xff]  ;;  %v240_v62 = vld [vmem:[#allocation4 + $0x98] sm:$0xff] }
  0x31   :  { %473 = vmatprep.subr.mxu0 %v246_v38  ;;  %508 = vmatprep.subr.mxu1 %v278_v39  ;;  %v257_v61 = vld [vmem:[#allocation4 + $0x120] sm:$0xff]  ;;  %v272_v63 = vld [vmem:[#allocation4 + $0x198] sm:$0xff]  ;;  %v239_v2 = vld [vmem:[#allocation4 + $0x90] sm:$0xff] }
  0x32   :  { %474 = vmatpush3.msra.mxu0 %v230_v40  ;;  %509 = vmatpush3.msra.mxu1 %v262_v41  ;;  %v224_v0 = vld [vmem:[#allocation4 + $0x18] sm:$0xff]  ;;  %v271_v3 = vld [vmem:[#allocation4 + $0x190] sm:$0xff]  ;;  %v238_v6 = vld [vmem:[#allocation4 + $0x88] sm:$0xff] }
  0x33   :  { %475 = vmatprep.subr.mxu0 %v245_v42  ;;  %510 = vmatprep.subr.mxu1 %v277_v43  ;;  %v256_v1 = vld [vmem:[#allocation4 + $0x118] sm:$0xff]  ;;  %v223_v4 = vld [vmem:[#allocation4 + $0x10] sm:$0xff]  ;;  %v270_v7 = vld [vmem:[#allocation4 + $0x188] sm:$0xff] }
  0x34   :  { %476 = vmatpush3.msra.mxu0 %v229_v44  ;;  %511 = vmatpush3.msra.mxu1 %v261_v45  ;;  %v255_v5 = vld [vmem:[#allocation4 + $0x110] sm:$0xff]  ;;  %v222_v8 = vld [vmem:[#allocation4 + $0x8] sm:$0xff]  ;;  %v237_v10 = vld [vmem:[#allocation4 + $0x80] sm:$0xff] }
  0x35   :  { %477 = vmatprep.subr.mxu0 %v244_v46  ;;  %512 = vmatprep.subr.mxu1 %v276_v47  ;;  %v254_v9 = vld [vmem:[#allocation4 + $0x108] sm:$0xff]  ;;  %v269_v11 = vld [vmem:[#allocation4 + $0x180] sm:$0xff] }
  0x36   :  { %478 = vmatpush3.msra.mxu0 %v228_v48  ;;  %513 = vmatpush3.msra.mxu1 %v260_v49  ;;  %v221_v12 = vld [vmem:[#allocation4] sm:$0xff] }
  0x37   :  { %479 = vmatprep.subr.mxu0 %v243_v50  ;;  %514 = vmatprep.subr.mxu1 %v275_v51  ;;  %v253_v13 = vld [vmem:[#allocation4 + $0x100] sm:$0xff] }
  0x38   :  { %480 = vmatpush3.msra.mxu0 %v227_v52  ;;  %515 = vmatpush3.msra.mxu1 %v259_v53  ;;  %v460_v25 = vld [vmem:[%s636_s3] ss:$0 sm:$0xff] }
  0x39   :  { %481 = vmatprep.subr.mxu0 %v242_v54  ;;  %516 = vmatprep.subr.mxu1 %v274_v55 }
  0x3a   :  { %482 = vmatpush3.msra.mxu0 %v226_v56  ;;  %517 = vmatpush3.msra.mxu1 %v258_v57 }
  0x3b   :  { %483 = vmatprep.subr.mxu0 %v241_v58  ;;  %518 = vmatprep.subr.mxu1 %v273_v59 }
  0x3c   :  { %484 = vmatpush3.msra.mxu0 %v225_v60  ;;  %519 = vmatpush3.msra.mxu1 %v257_v61 }
  0x3d   :  { %485 = vmatprep.subr.mxu0 %v240_v62  ;;  %520 = vmatprep.subr.mxu1 %v272_v63 }
  0x3e   :  { %486 = vmatpush3.msra.mxu0 %v224_v0  ;;  %521 = vmatpush3.msra.mxu1 %v256_v1 }
  0x3f   :  { %487 = vmatprep.subr.mxu0 %v239_v2  ;;  %522 = vmatprep.subr.mxu1 %v271_v3 }
  0x40   :  { %488 = vmatpush3.msra.mxu0 %v223_v4  ;;  %523 = vmatpush3.msra.mxu1 %v255_v5 }
  0x41   :  { %489 = vmatprep.subr.mxu0 %v238_v6  ;;  %524 = vmatprep.subr.mxu1 %v270_v7 }
  0x42   :  { %490 = vmatpush3.msra.mxu0 %v222_v8  ;;  %525 = vmatpush3.msra.mxu1 %v254_v9 }
  0x43   :  { %491 = vmatprep.subr.mxu0 %v237_v10  ;;  %526 = vmatprep.subr.mxu1 %v269_v11 }
  0x44   :  { %492 = vmatpush3.msra.mxu0 %v221_v12  ;;  %527 = vmatpush3.msra.mxu1 %v253_v13 }
  0xe4   :  { %v141_v14 = vpop.f32.mrf.mxu0  ;;  %v212_v15 = vpop.f32.mrf.mxu1 }
  0xe5   :  { %v219_v16 = vmax.f32 %v212_v15, 0.0  ;;  %v217_v21 = vmax.f32 %v141_v14, 0.0 }
  0xe6   :  { %v143_v17 = vpop.f32.mrf.mxu0  ;;  %v214_v18 = vpop.f32.mrf.mxu1 }
  0xe7   :  { %v218_v19 = vmax.f32 %v143_v17, 0.0  ;;  %v220_v20 = vmax.f32 %v214_v18, 0.0 }
  0xe9   :  { %356 = vmatprep.mubr.f32.mxu0 %v218_v19  ;;  %426 = vmatprep.mubr.f32.mxu1 %v220_v20 }
  0xea   :  { %357 = vmatmul.mubr.f32.vlgmr.msra.gmra.mxu0 %v217_v21  ;;  %427 = vmatmul.mubr.f32.vlgmr.msra.gmra.mxu1 %v219_v16 }
 0x1aa   :  { %v493_v23 = vpop.f32.mrf.mxu0  ;;  %v528_v24 = vpop.f32.mrf.mxu1 }
 0x1ac   :  { %v494_v26 = vpop.f32.mrf.mxu0  ;;  %v529_v27 = vpop.f32.mrf.mxu1 }
 0x1ad   :  { %v495_v29 = vadd.f32 %v494_v26, %v493_v23  ;;  %v530_v31 = vadd.f32 %v529_v27, %v528_v24 }
 0x1af   :  { %v359_v30 = vadd.f32 %v495_v29, %v460_v25 }
 0x1b1   :  { %v429_v32 = vadd.f32 %v530_v31, %v359_v30 }
 0x1b3   :  { %v435_v33 = vsel %vm434_vm2, %v429_v32, -inf }
 0x1b4   :  { %436 = vmax.xlane.f32.xlu0 %v435_v33 }
 0x23d   :  { %v437_v34 = vpop.xlane.xlu0 %436 }
 0x23e   :  { %v438_v35 = vsub.f32 %v435_v33, %v437_v34 }
 0x240   :  { %v439_v36 = vmul.f32 1.442695, %v438_v35 }
 0x242   :  { %538 = vpow2.f32 %v439_v36 }
 0x24f   :  { %v539_v37 = vpop.eup %538 }
 0x250   :  { %441 = vadd.xlane.f32.xlu0 %v539_v37 }
 0x2d9   :  { %v442_v38 = vpop.xlane.xlu0 %441 }
 0x2da   :  { %540 = vrcp.f32 %v442_v38 }
 0x2e7   :  { %v541_v39 = vpop.eup %540 }
 0x2e8   :  { %v444_v40 = vmul.f32 %v541_v39, %v539_v37 }
 0x2ea   :  { %v446_v41 = vsel %vm445_vm3, %v429_v32, %v444_v40 }
 0x2eb   :  { %447 = vst [vmem:[%s637_s4] sm:$0xff] %v446_v41 }
 0x2ec   :  { %452 = vsyncpa [#allocation3], 1 }
 0x2ed   :  { %453 = vsyncpa [#allocation5], 1 }

</bundles_post_ra>
